<compile_context>
chip_gen: v6e
topology: v6e:2x2x1
jax: 0.10.0
libtpu: 0.0.40
codegen_flags: <defaults>
</compile_context>

<pallas_src>
import functools
import math

import jax
import jax.numpy as jnp
from jax import lax
from jax.experimental import pallas as pl
from jax.experimental.pallas import tpu as pltpu


def _mha_fused_kernel(q_ref, k_ref, v_ref, wq_ref, wk_ref, wv_ref, wo_ref, b_ref,
                      o_ref, k_proj_scr, v_proj_scr, *, h, d_h):
    # q_ref: (1, block_q, d_model) f32      k_ref/v_ref: (1, seq, d_model) f32
    # wq/wk/wv: (d_model, h*d_h) bf16 (wq pre-scaled by 1/sqrt(d_h))
    # wo: (h*d_h, d_model) bf16             b: (1, d_model) f32
    # o_ref: (1, block_q, d_model)
    # k_proj_scr / v_proj_scr: persistent VMEM scratch (seq, h*d_h) bf16
    qi = pl.program_id(1)

    # --- K/V projections: once per batch element, cached across q-blocks. ---
    @pl.when(qi == 0)
    def _():
        k_in = k_ref[0].astype(jnp.bfloat16)
        v_in = v_ref[0].astype(jnp.bfloat16)
        k_proj_scr[...] = jnp.dot(
            k_in, wk_ref[...], preferred_element_type=jnp.float32
        ).astype(jnp.bfloat16)
        v_proj_scr[...] = jnp.dot(
            v_in, wv_ref[...], preferred_element_type=jnp.float32
        ).astype(jnp.bfloat16)

    # --- Q projection for this q-block (scale already folded into wq). ---
    q_in = q_ref[0].astype(jnp.bfloat16)
    q_all = jnp.dot(q_in, wq_ref[...],
                    preferred_element_type=jnp.float32).astype(jnp.bfloat16)

    k_all = k_proj_scr[...]          # (seq, h*d_h) bf16
    v_all = v_proj_scr[...]          # (seq, h*d_h) bf16

    # --- Per-head attention (static unrolled loop; h is small). ---
    ohs = []
    for hi in range(h):
        lo = hi * d_h
        qh = q_all[:, lo:lo + d_h]
        kh = k_all[:, lo:lo + d_h]
        vh = v_all[:, lo:lo + d_h]

        # scores = q_h @ k_h^T without materializing a transpose of k_h
        s = lax.dot_general(qh, kh, (((1,), (1,)), ((), ())),
                            preferred_element_type=jnp.float32)  # (block_q, seq)
        m = jnp.max(s, axis=-1, keepdims=True)
        p = jnp.exp(s - m)                                       # f32
        l = jnp.sum(p, axis=-1, keepdims=True)                   # f32 row sums
        oh = jnp.dot(p.astype(jnp.bfloat16), vh,
                     preferred_element_type=jnp.float32)         # (block_q, d_h)
        ohs.append(oh / l)   # exact normalization on the narrow (d_h) result

    # --- Single wide output projection over the head concat + bias. ---
    attn = jnp.concatenate(ohs, axis=-1).astype(jnp.bfloat16)    # (block_q, h*d_h)
    y = jnp.dot(attn, wo_ref[...], preferred_element_type=jnp.float32)
    o_ref[0] = (y + b_ref[...]).astype(o_ref.dtype)


def multi_head_attention(Qs, Ks, Vs, W_Q, W_K, W_V, lin_w, lin_b, *, block_q=None):
    """Forward pass matching the PyTorch MultiHeadAttention module (mask_3d=None).

    Qs, Ks, Vs: (batch, seq, d_model) f32
    W_Q, W_K, W_V: (h, d_model, d_h)
    lin_w: (d_model, h*d_h)   (PyTorch nn.Linear weight), lin_b: (d_model,)
    """
    batch, seq, d_model = Qs.shape
    h, _, d_h = W_Q.shape
    scale = 1.0 / math.sqrt(d_h)

    # Moderate default q tile (don't default to seq): keeps the (block_q, seq)
    # f32 score tile VMEM-friendly and lets the Q/out pipeline overlap DMA.
    if block_q is None:
        block_q = 256 if (seq % 256 == 0) else seq
    assert seq % block_q == 0 and (block_q == seq or block_q % 8 == 0)
    n_q = seq // block_q

    # Pack per-head projection weights head-major along the last axis (exactly
    # the torch chunk/cat order), fold 1/sqrt(d_h) into W_Q, and cast weights
    # to bf16 so every matmul feeds the MXU bf16 operands (f32 accumulate).
    wq_all = (jnp.transpose(W_Q, (1, 0, 2)).reshape(d_model, h * d_h)
              * jnp.float32(scale)).astype(jnp.bfloat16)
    wk_all = jnp.transpose(W_K, (1, 0, 2)).reshape(d_model, h * d_h).astype(jnp.bfloat16)
    wv_all = jnp.transpose(W_V, (1, 0, 2)).reshape(d_model, h * d_h).astype(jnp.bfloat16)
    wo_t = lin_w.T.astype(jnp.bfloat16)               # (h*d_h, d_model)
    b2 = lin_b.reshape(1, d_model).astype(jnp.float32)

    flops = int(2 * batch * seq * d_model * (h * d_h)          # Q projection
                + 4 * batch * seq * d_model * (h * d_h)        # K, V (once per batch)
                + 4 * batch * h * seq * seq * d_h              # QK^T and PV
                + 2 * batch * seq * (h * d_h) * d_model)       # output linear
    bytes_accessed = int(4 * 4 * batch * seq * d_model         # Q, K, V in + out (f32)
                         + 2 * 4 * d_model * (h * d_h)         # bf16 weights
                         + 4 * d_model)                        # f32 bias
    cost = pl.CostEstimate(flops=flops,
                           transcendentals=int(batch * h * seq * seq),
                           bytes_accessed=bytes_accessed)

    kernel = functools.partial(_mha_fused_kernel, h=h, d_h=d_h)

    return pl.pallas_call(
        kernel,
        out_shape=jax.ShapeDtypeStruct((batch, seq, d_model), Qs.dtype),
        grid=(batch, n_q),
        in_specs=[
            pl.BlockSpec((1, block_q, d_model), lambda b, qi: (b, qi, 0)),  # Q tile
            pl.BlockSpec((1, seq, d_model), lambda b, qi: (b, 0, 0)),       # K (resident over qi)
            pl.BlockSpec((1, seq, d_model), lambda b, qi: (b, 0, 0)),       # V (resident over qi)
            pl.BlockSpec((d_model, h * d_h), lambda b, qi: (0, 0)),         # Wq (pre-scaled, bf16)
            pl.BlockSpec((d_model, h * d_h), lambda b, qi: (0, 0)),         # Wk (bf16)
            pl.BlockSpec((d_model, h * d_h), lambda b, qi: (0, 0)),         # Wv (bf16)
            pl.BlockSpec((h * d_h, d_model), lambda b, qi: (0, 0)),         # Wo^T (bf16)
            pl.BlockSpec((1, d_model), lambda b, qi: (0, 0)),               # bias
        ],
        out_specs=pl.BlockSpec((1, block_q, d_model), lambda b, qi: (b, qi, 0)),
        # Persistent K/V projection caches (bf16 halves their VMEM footprint).
        scratch_shapes=[pltpu.VMEM((seq, h * d_h), jnp.bfloat16),
                        pltpu.VMEM((seq, h * d_h), jnp.bfloat16)],
        # qi must be "arbitrary": the cached K/V projections in scratch carry a
        # dependence on qi == 0 of each batch step.  batch stays "parallel".
        compiler_params=pltpu.CompilerParams(
            dimension_semantics=("parallel", "arbitrary")),
        cost_estimate=cost,
    )(Qs, Ks, Vs, wq_all, wk_all, wv_all, wo_t, b2)


def _reference_matched_precision(Qs, Ks, Vs, W_Q, W_K, W_V, lin_w, lin_b):
    """Pure-JAX reference mirroring the PyTorch forward (mask_3d=None).

    Built independently of the kernel's packed weights (per-head einsums, torch
    chunk/cat head order), but with the SAME bf16 operand quantization the
    kernel applies to feed the MXU, so the comparison validates the fused data
    flow (head packing, softmax, output linear) to tight tolerance without
    conflating it with bf16 rounding of the math itself.
    """
    h, d_model, d_h = W_Q.shape
    bf = jnp.bfloat16
    scale = jnp.float32(1.0 / math.sqrt(d_h))

    q = jnp.einsum('bjk,hkl->hbjl', Qs.astype(bf), (W_Q * scale).astype(bf),
                   preferred_element_type=jnp.float32).astype(bf)
    k = jnp.einsum('bjk,hkl->hbjl', Ks.astype(bf), W_K.astype(bf),
                   preferred_element_type=jnp.float32).astype(bf)
    v = jnp.einsum('bjk,hkl->hbjl', Vs.astype(bf), W_V.astype(bf),
                   preferred_element_type=jnp.float32).astype(bf)

    s = jnp.einsum('hbqd,hbkd->hbqk', q, k, preferred_element_type=jnp.float32)
    m = jnp.max(s, axis=-1, keepdims=True)
    p = jnp.exp(s - m)
    l = jnp.sum(p, axis=-1, keepdims=True)
    o = jnp.einsum('hbqk,hbkd->hbqd', p.astype(bf), v,
                   preferred_element_type=jnp.float32) / l          # (h,b,s,d_h)

    concat = jnp.transpose(o, (1, 2, 0, 3)).reshape(
        Qs.shape[0], Qs.shape[1], h * d_h)                           # head-major
    y = jnp.einsum('bsk,kd->bsd', concat.astype(bf), lin_w.T.astype(bf),
                   preferred_element_type=jnp.float32)
    return y + lin_b


if __name__ == "__main__":
    batch, seq, d_model, h = 2, 16, 32, 4
    d_h = d_model // h

    key = jax.random.PRNGKey(0)
    ks = jax.random.split(key, 8)

    # deterministic "torch.rand"-style params
    W_Q = jax.random.uniform(ks[0], (h, d_model, d_h), jnp.float32)
    W_K = jax.random.uniform(ks[1], (h, d_model, d_h), jnp.float32)
    W_V = jax.random.uniform(ks[2], (h, d_model, d_h), jnp.float32)
    bound = 1.0 / math.sqrt(h * d_h)
    lin_w = jax.random.uniform(ks[3], (d_model, h * d_h), jnp.float32,
                               minval=-bound, maxval=bound)
    lin_b = jax.random.uniform(ks[4], (d_model,), jnp.float32,
                               minval=-bound, maxval=bound)

    Qs = jax.random.normal(ks[5], (batch, seq, d_model), jnp.float32)
    Ks = jax.random.normal(ks[6], (batch, seq, d_model), jnp.float32)
    Vs = jax.random.normal(ks[7], (batch, seq, d_model), jnp.float32)

    # block_q=8 < seq so the q-axis iterates and exercises the cached K/V
    # projection path (pl.when(qi == 0) compute + scratch reuse at qi == 1).
    out = multi_head_attention(Qs, Ks, Vs, W_Q, W_K, W_V, lin_w, lin_b, block_q=8)
    out = jax.block_until_ready(out)

    ref = _reference_matched_precision(Qs, Ks, Vs, W_Q, W_K, W_V, lin_w, lin_b)
    assert out.shape == (batch, seq, d_model)
    assert jnp.allclose(out, ref, atol=1e-2, rtol=1e-2), (
        "mismatch vs reference: max abs err = %e"
        % float(jnp.max(jnp.abs(out - ref))))

    print("KERNEL_OK")
</pallas_src>

<mosaic_0001>
module attributes {stable_mosaic.version = 11 : i64} {
  func.func @_mha_fused_kernel(%arg0: i32, %arg1: i32, %arg2: memref<1x8x32xf32, #tpu.memory_space<vmem>>, %arg3: memref<1x16x32xf32, #tpu.memory_space<vmem>>, %arg4: memref<1x16x32xf32, #tpu.memory_space<vmem>>, %arg5: memref<32x32xbf16, #tpu.memory_space<vmem>>, %arg6: memref<32x32xbf16, #tpu.memory_space<vmem>>, %arg7: memref<32x32xbf16, #tpu.memory_space<vmem>>, %arg8: memref<32x32xbf16, #tpu.memory_space<vmem>>, %arg9: memref<1x32xf32, #tpu.memory_space<vmem>>, %arg10: memref<1x8x32xf32, #tpu.memory_space<vmem>>, %arg11: memref<16x32xbf16, #tpu.memory_space<vmem>>, %arg12: memref<16x32xbf16, #tpu.memory_space<vmem>>) attributes {dimension_semantics = [#tpu.dimension_semantics<parallel>, #tpu.dimension_semantics<arbitrary>], iteration_bounds = array<i64: 2, 2>, scalar_prefetch = 0 : i64, scratch_operands = 2 : i64, tpu.core_type = #tpu.core_type<tc>, window_params = [{transform_indices = @transform_0, window_bounds = array<i64: 1, 8, 32>}, {transform_indices = @transform_1, window_bounds = array<i64: 1, 16, 32>}, {transform_indices = @transform_2, window_bounds = array<i64: 1, 16, 32>}, {pipeline_mode = #tpu.pipeline_mode<synchronous>, transform_indices = @transform_3, window_bounds = array<i64: 32, 32>}, {pipeline_mode = #tpu.pipeline_mode<synchronous>, transform_indices = @transform_4, window_bounds = array<i64: 32, 32>}, {pipeline_mode = #tpu.pipeline_mode<synchronous>, transform_indices = @transform_5, window_bounds = array<i64: 32, 32>}, {pipeline_mode = #tpu.pipeline_mode<synchronous>, transform_indices = @transform_6, window_bounds = array<i64: 32, 32>}, {pipeline_mode = #tpu.pipeline_mode<synchronous>, transform_indices = @transform_7, window_bounds = array<i64: 1, 32>}, {transform_indices = @transform_8, window_bounds = array<i64: 1, 8, 32>}]} {
    %c0_i32 = arith.constant 0 : i32
    %0 = arith.cmpi eq, %arg1, %c0_i32 : i32
    %1 = arith.extui %0 : i1 to i32
    %c0_i32_0 = arith.constant 0 : i32
    %2 = arith.cmpi ne, %1, %c0_i32_0 : i32
    scf.if %2 {
      %c0_33 = arith.constant 0 : index
      %c0_34 = arith.constant 0 : index
      %c0_35 = arith.constant 0 : index
      %81 = vector.load %arg3[%c0_33, %c0_34, %c0_35] : memref<1x16x32xf32, #tpu.memory_space<vmem>>, vector<1x16x32xf32>
      %82 = vector.shape_cast %81 : vector<1x16x32xf32> to vector<16x32xf32>
      %83 = arith.truncf %82 : vector<16x32xf32> to vector<16x32xbf16>
      %c0_36 = arith.constant 0 : index
      %c0_37 = arith.constant 0 : index
      %c0_38 = arith.constant 0 : index
      %84 = vector.load %arg4[%c0_36, %c0_37, %c0_38] : memref<1x16x32xf32, #tpu.memory_space<vmem>>, vector<1x16x32xf32>
      %85 = vector.shape_cast %84 : vector<1x16x32xf32> to vector<16x32xf32>
      %86 = arith.truncf %85 : vector<16x32xf32> to vector<16x32xbf16>
      %c0_39 = arith.constant 0 : index
      %c0_40 = arith.constant 0 : index
      %87 = vector.load %arg6[%c0_39, %c0_40] : memref<32x32xbf16, #tpu.memory_space<vmem>>, vector<32x32xbf16>
      %cst_41 = arith.constant dense<0.000000e+00> : vector<16x32xf32>
      %88 = tpu.matmul %83, %87, %cst_41 {dimension_numbers = #tpu.dot_dimension_numbers<[1], [0], [0], [1], [0, 0, 1, 1], [], []>} : vector<16x32xbf16>, vector<32x32xbf16>, vector<16x32xf32> -> vector<16x32xf32>
      %89 = arith.truncf %88 : vector<16x32xf32> to vector<16x32xbf16>
      %c0_42 = arith.constant 0 : index
      %c0_43 = arith.constant 0 : index
      %90 = vector.load %arg11[%c0_42, %c0_43] : memref<16x32xbf16, #tpu.memory_space<vmem>>, vector<16x32xbf16>
      tpu.vector_store %arg11[%c0_42, %c0_43], %89 {strides = array<i32>} : memref<16x32xbf16, #tpu.memory_space<vmem>>, vector<16x32xbf16>,
      %c0_44 = arith.constant 0 : index
      %c0_45 = arith.constant 0 : index
      %91 = vector.load %arg7[%c0_44, %c0_45] : memref<32x32xbf16, #tpu.memory_space<vmem>>, vector<32x32xbf16>
      %cst_46 = arith.constant dense<0.000000e+00> : vector<16x32xf32>
      %92 = tpu.matmul %86, %91, %cst_46 {dimension_numbers = #tpu.dot_dimension_numbers<[1], [0], [0], [1], [0, 0, 1, 1], [], []>} : vector<16x32xbf16>, vector<32x32xbf16>, vector<16x32xf32> -> vector<16x32xf32>
      %93 = arith.truncf %92 : vector<16x32xf32> to vector<16x32xbf16>
      %c0_47 = arith.constant 0 : index
      %c0_48 = arith.constant 0 : index
      %94 = vector.load %arg12[%c0_47, %c0_48] : memref<16x32xbf16, #tpu.memory_space<vmem>>, vector<16x32xbf16>
      tpu.vector_store %arg12[%c0_47, %c0_48], %93 {strides = array<i32>} : memref<16x32xbf16, #tpu.memory_space<vmem>>, vector<16x32xbf16>,
    } else {
    }
    %c0 = arith.constant 0 : index
    %c0_1 = arith.constant 0 : index
    %c0_2 = arith.constant 0 : index
    %3 = vector.load %arg2[%c0, %c0_1, %c0_2] : memref<1x8x32xf32, #tpu.memory_space<vmem>>, vector<1x8x32xf32>
    %4 = vector.shape_cast %3 : vector<1x8x32xf32> to vector<8x32xf32>
    %5 = arith.truncf %4 : vector<8x32xf32> to vector<8x32xbf16>
    %c0_3 = arith.constant 0 : index
    %c0_4 = arith.constant 0 : index
    %6 = vector.load %arg5[%c0_3, %c0_4] : memref<32x32xbf16, #tpu.memory_space<vmem>>, vector<32x32xbf16>
    %cst = arith.constant dense<0.000000e+00> : vector<8x32xf32>
    %7 = tpu.matmul %5, %6, %cst {dimension_numbers = #tpu.dot_dimension_numbers<[1], [0], [0], [1], [0, 0, 1, 1], [], []>} : vector<8x32xbf16>, vector<32x32xbf16>, vector<8x32xf32> -> vector<8x32xf32>
    %8 = arith.truncf %7 : vector<8x32xf32> to vector<8x32xbf16>
    %c0_5 = arith.constant 0 : index
    %c0_6 = arith.constant 0 : index
    %9 = vector.load %arg11[%c0_5, %c0_6] : memref<16x32xbf16, #tpu.memory_space<vmem>>, vector<16x32xbf16>
    %c0_7 = arith.constant 0 : index
    %c0_8 = arith.constant 0 : index
    %10 = vector.load %arg12[%c0_7, %c0_8] : memref<16x32xbf16, #tpu.memory_space<vmem>>, vector<16x32xbf16>
    %11 = vector.extract_strided_slice %8 {offsets = [0, 0], sizes = [8, 8], strides = [1, 1]} : vector<8x32xbf16> to vector<8x8xbf16>
    %12 = vector.extract_strided_slice %9 {offsets = [0, 0], sizes = [16, 8], strides = [1, 1]} : vector<16x32xbf16> to vector<16x8xbf16>
    %13 = vector.extract_strided_slice %10 {offsets = [0, 0], sizes = [16, 8], strides = [1, 1]} : vector<16x32xbf16> to vector<16x8xbf16>
    %cst_9 = arith.constant dense<0.000000e+00> : vector<8x16xf32>
    %14 = tpu.matmul %11, %12, %cst_9 {dimension_numbers = #tpu.dot_dimension_numbers<[1], [1], [0], [0], [0, 0, 1, 0], [], []>} : vector<8x8xbf16>, vector<16x8xbf16>, vector<8x16xf32> -> vector<8x16xf32>
    %cst_10 = arith.constant dense<0xFF800000> : vector<8xf32>
    %15 = vector.multi_reduction <maximumf>, %14, %cst_10 [1] : vector<8x16xf32> to vector<8xf32>
    %16 = vector.shape_cast %15 : vector<8xf32> to vector<8x1xf32>
    %17 = vector.broadcast %16 : vector<8x1xf32> to vector<8x16xf32>
    %18 = arith.subf %14, %17 : vector<8x16xf32>
    %19 = math.exp %18 : vector<8x16xf32>
    %cst_11 = arith.constant dense<0.000000e+00> : vector<8xf32>
    %20 = vector.multi_reduction <add>, %19, %cst_11 [1] : vector<8x16xf32> to vector<8xf32>
    %21 = vector.shape_cast %20 : vector<8xf32> to vector<8x1xf32>
    %22 = arith.truncf %19 : vector<8x16xf32> to vector<8x16xbf16>
    %cst_12 = arith.constant dense<0.000000e+00> : vector<8x8xf32>
    %23 = tpu.matmul %22, %13, %cst_12 {dimension_numbers = #tpu.dot_dimension_numbers<[1], [0], [0], [1], [0, 0, 1, 1], [], []>} : vector<8x16xbf16>, vector<16x8xbf16>, vector<8x8xf32> -> vector<8x8xf32>
    %24 = vector.broadcast %21 : vector<8x1xf32> to vector<8x8xf32>
    %25 = arith.divf %23, %24 : vector<8x8xf32>
    %26 = vector.extract_strided_slice %8 {offsets = [0, 8], sizes = [8, 8], strides = [1, 1]} : vector<8x32xbf16> to vector<8x8xbf16>
    %27 = vector.extract_strided_slice %9 {offsets = [0, 8], sizes = [16, 8], strides = [1, 1]} : vector<16x32xbf16> to vector<16x8xbf16>
    %28 = vector.extract_strided_slice %10 {offsets = [0, 8], sizes = [16, 8], strides = [1, 1]} : vector<16x32xbf16> to vector<16x8xbf16>
    %cst_13 = arith.constant dense<0.000000e+00> : vector<8x16xf32>
    %29 = tpu.matmul %26, %27, %cst_13 {dimension_numbers = #tpu.dot_dimension_numbers<[1], [1], [0], [0], [0, 0, 1, 0], [], []>} : vector<8x8xbf16>, vector<16x8xbf16>, vector<8x16xf32> -> vector<8x16xf32>
    %cst_14 = arith.constant dense<0xFF800000> : vector<8xf32>
    %30 = vector.multi_reduction <maximumf>, %29, %cst_14 [1] : vector<8x16xf32> to vector<8xf32>
    %31 = vector.shape_cast %30 : vector<8xf32> to vector<8x1xf32>
    %32 = vector.broadcast %31 : vector<8x1xf32> to vector<8x16xf32>
    %33 = arith.subf %29, %32 : vector<8x16xf32>
    %34 = math.exp %33 : vector<8x16xf32>
    %cst_15 = arith.constant dense<0.000000e+00> : vector<8xf32>
    %35 = vector.multi_reduction <add>, %34, %cst_15 [1] : vector<8x16xf32> to vector<8xf32>
    %36 = vector.shape_cast %35 : vector<8xf32> to vector<8x1xf32>
    %37 = arith.truncf %34 : vector<8x16xf32> to vector<8x16xbf16>
    %cst_16 = arith.constant dense<0.000000e+00> : vector<8x8xf32>
    %38 = tpu.matmul %37, %28, %cst_16 {dimension_numbers = #tpu.dot_dimension_numbers<[1], [0], [0], [1], [0, 0, 1, 1], [], []>} : vector<8x16xbf16>, vector<16x8xbf16>, vector<8x8xf32> -> vector<8x8xf32>
    %39 = vector.broadcast %36 : vector<8x1xf32> to vector<8x8xf32>
    %40 = arith.divf %38, %39 : vector<8x8xf32>
    %41 = vector.extract_strided_slice %8 {offsets = [0, 16], sizes = [8, 8], strides = [1, 1]} : vector<8x32xbf16> to vector<8x8xbf16>
    %42 = vector.extract_strided_slice %9 {offsets = [0, 16], sizes = [16, 8], strides = [1, 1]} : vector<16x32xbf16> to vector<16x8xbf16>
    %43 = vector.extract_strided_slice %10 {offsets = [0, 16], sizes = [16, 8], strides = [1, 1]} : vector<16x32xbf16> to vector<16x8xbf16>
    %cst_17 = arith.constant dense<0.000000e+00> : vector<8x16xf32>
    %44 = tpu.matmul %41, %42, %cst_17 {dimension_numbers = #tpu.dot_dimension_numbers<[1], [1], [0], [0], [0, 0, 1, 0], [], []>} : vector<8x8xbf16>, vector<16x8xbf16>, vector<8x16xf32> -> vector<8x16xf32>
    %cst_18 = arith.constant dense<0xFF800000> : vector<8xf32>
    %45 = vector.multi_reduction <maximumf>, %44, %cst_18 [1] : vector<8x16xf32> to vector<8xf32>
    %46 = vector.shape_cast %45 : vector<8xf32> to vector<8x1xf32>
    %47 = vector.broadcast %46 : vector<8x1xf32> to vector<8x16xf32>
    %48 = arith.subf %44, %47 : vector<8x16xf32>
    %49 = math.exp %48 : vector<8x16xf32>
    %cst_19 = arith.constant dense<0.000000e+00> : vector<8xf32>
    %50 = vector.multi_reduction <add>, %49, %cst_19 [1] : vector<8x16xf32> to vector<8xf32>
    %51 = vector.shape_cast %50 : vector<8xf32> to vector<8x1xf32>
    %52 = arith.truncf %49 : vector<8x16xf32> to vector<8x16xbf16>
    %cst_20 = arith.constant dense<0.000000e+00> : vector<8x8xf32>
    %53 = tpu.matmul %52, %43, %cst_20 {dimension_numbers = #tpu.dot_dimension_numbers<[1], [0], [0], [1], [0, 0, 1, 1], [], []>} : vector<8x16xbf16>, vector<16x8xbf16>, vector<8x8xf32> -> vector<8x8xf32>
    %54 = vector.broadcast %51 : vector<8x1xf32> to vector<8x8xf32>
    %55 = arith.divf %53, %54 : vector<8x8xf32>
    %56 = vector.extract_strided_slice %8 {offsets = [0, 24], sizes = [8, 8], strides = [1, 1]} : vector<8x32xbf16> to vector<8x8xbf16>
    %57 = vector.extract_strided_slice %9 {offsets = [0, 24], sizes = [16, 8], strides = [1, 1]} : vector<16x32xbf16> to vector<16x8xbf16>
    %58 = vector.extract_strided_slice %10 {offsets = [0, 24], sizes = [16, 8], strides = [1, 1]} : vector<16x32xbf16> to vector<16x8xbf16>
    %cst_21 = arith.constant dense<0.000000e+00> : vector<8x16xf32>
    %59 = tpu.matmul %56, %57, %cst_21 {dimension_numbers = #tpu.dot_dimension_numbers<[1], [1], [0], [0], [0, 0, 1, 0], [], []>} : vector<8x8xbf16>, vector<16x8xbf16>, vector<8x16xf32> -> vector<8x16xf32>
    %cst_22 = arith.constant dense<0xFF800000> : vector<8xf32>
    %60 = vector.multi_reduction <maximumf>, %59, %cst_22 [1] : vector<8x16xf32> to vector<8xf32>
    %61 = vector.shape_cast %60 : vector<8xf32> to vector<8x1xf32>
    %62 = vector.broadcast %61 : vector<8x1xf32> to vector<8x16xf32>
    %63 = arith.subf %59, %62 : vector<8x16xf32>
    %64 = math.exp %63 : vector<8x16xf32>
    %cst_23 = arith.constant dense<0.000000e+00> : vector<8xf32>
    %65 = vector.multi_reduction <add>, %64, %cst_23 [1] : vector<8x16xf32> to vector<8xf32>
    %66 = vector.shape_cast %65 : vector<8xf32> to vector<8x1xf32>
    %67 = arith.truncf %64 : vector<8x16xf32> to vector<8x16xbf16>
    %cst_24 = arith.constant dense<0.000000e+00> : vector<8x8xf32>
    %68 = tpu.matmul %67, %58, %cst_24 {dimension_numbers = #tpu.dot_dimension_numbers<[1], [0], [0], [1], [0, 0, 1, 1], [], []>} : vector<8x16xbf16>, vector<16x8xbf16>, vector<8x8xf32> -> vector<8x8xf32>
    %69 = vector.broadcast %66 : vector<8x1xf32> to vector<8x8xf32>
    %70 = arith.divf %68, %69 : vector<8x8xf32>
    %71 = tpu.concatenate %25, %40, %55, %70 in 1 : vector<8x8xf32>, vector<8x8xf32>, vector<8x8xf32>, vector<8x8xf32> -> vector<8x32xf32>
    %72 = arith.truncf %71 : vector<8x32xf32> to vector<8x32xbf16>
    %c0_25 = arith.constant 0 : index
    %c0_26 = arith.constant 0 : index
    %73 = vector.load %arg8[%c0_25, %c0_26] : memref<32x32xbf16, #tpu.memory_space<vmem>>, vector<32x32xbf16>
    %cst_27 = arith.constant dense<0.000000e+00> : vector<8x32xf32>
    %74 = tpu.matmul %72, %73, %cst_27 {dimension_numbers = #tpu.dot_dimension_numbers<[1], [0], [0], [1], [0, 0, 1, 1], [], []>} : vector<8x32xbf16>, vector<32x32xbf16>, vector<8x32xf32> -> vector<8x32xf32>
    %c0_28 = arith.constant 0 : index
    %c0_29 = arith.constant 0 : index
    %75 = vector.load %arg9[%c0_28, %c0_29] : memref<1x32xf32, #tpu.memory_space<vmem>>, vector<1x32xf32>
    %76 = vector.broadcast %75 : vector<1x32xf32> to vector<8x32xf32>
    %77 = arith.addf %74, %76 : vector<8x32xf32>
    %c0_30 = arith.constant 0 : index
    %c0_31 = arith.constant 0 : index
    %c0_32 = arith.constant 0 : index
    %78 = vector.load %arg10[%c0_30, %c0_31, %c0_32] : memref<1x8x32xf32, #tpu.memory_space<vmem>>, vector<1x8x32xf32>
    %79 = vector.shape_cast %78 : vector<1x8x32xf32> to vector<8x32xf32>
    %80 = vector.shape_cast %77 : vector<8x32xf32> to vector<1x8x32xf32>
    tpu.vector_store %arg10[%c0_30, %c0_31, %c0_32], %80 {strides = array<i32>} : memref<1x8x32xf32, #tpu.memory_space<vmem>>, vector<1x8x32xf32>,
    return
  }
  func.func @transform_0(%arg0: i32, %arg1: i32) -> (i32, i32, i32) {
    %c0_i32 = arith.constant 0 : i32
    %c0_i32_0 = arith.constant 0 : i32
    return %arg0, %arg1, %c0_i32 : i32, i32, i32
  }
  func.func @transform_1(%arg0: i32, %arg1: i32) -> (i32, i32, i32) {
    %c0_i32 = arith.constant 0 : i32
    %c0_i32_0 = arith.constant 0 : i32
    %c0_i32_1 = arith.constant 0 : i32
    return %arg0, %c0_i32, %c0_i32_0 : i32, i32, i32
  }
  func.func @transform_2(%arg0: i32, %arg1: i32) -> (i32, i32, i32) {
    %c0_i32 = arith.constant 0 : i32
    %c0_i32_0 = arith.constant 0 : i32
    %c0_i32_1 = arith.constant 0 : i32
    return %arg0, %c0_i32, %c0_i32_0 : i32, i32, i32
  }
  func.func @transform_3(%arg0: i32, %arg1: i32) -> (i32, i32) {
    %c0_i32 = arith.constant 0 : i32
    %c0_i32_0 = arith.constant 0 : i32
    %c0_i32_1 = arith.constant 0 : i32
    return %c0_i32, %c0_i32_0 : i32, i32
  }
  func.func @transform_4(%arg0: i32, %arg1: i32) -> (i32, i32) {
    %c0_i32 = arith.constant 0 : i32
    %c0_i32_0 = arith.constant 0 : i32
    %c0_i32_1 = arith.constant 0 : i32
    return %c0_i32, %c0_i32_0 : i32, i32
  }
  func.func @transform_5(%arg0: i32, %arg1: i32) -> (i32, i32) {
    %c0_i32 = arith.constant 0 : i32
    %c0_i32_0 = arith.constant 0 : i32
    %c0_i32_1 = arith.constant 0 : i32
    return %c0_i32, %c0_i32_0 : i32, i32
  }
  func.func @transform_6(%arg0: i32, %arg1: i32) -> (i32, i32) {
    %c0_i32 = arith.constant 0 : i32
    %c0_i32_0 = arith.constant 0 : i32
    %c0_i32_1 = arith.constant 0 : i32
    return %c0_i32, %c0_i32_0 : i32, i32
  }
  func.func @transform_7(%arg0: i32, %arg1: i32) -> (i32, i32) {
    %c0_i32 = arith.constant 0 : i32
    %c0_i32_0 = arith.constant 0 : i32
    %c0_i32_1 = arith.constant 0 : i32
    return %c0_i32, %c0_i32_0 : i32, i32
  }
  func.func @transform_8(%arg0: i32, %arg1: i32) -> (i32, i32, i32) {
    %c0_i32 = arith.constant 0 : i32
    %c0_i32_0 = arith.constant 0 : i32
    return %arg0, %arg1, %c0_i32 : i32, i32, i32
  }
}

</mosaic_0001>

<bundles_post_ra>
// kernel: tpu_custom_call.1
= control target key start
LH: loop header
LB: loop body
LE: loop exit
PB: predicated region body
PF: predicated region fallthrough
CT: control target
= control target key end

     0   :  { %s2592_s0 = inlined_call_operand.hbm [shape: f32[2,16,32], index: 0, kind: input, shape index: {}]   ;;  %s2593_s1 = inlined_call_operand.hbm [shape: f32[2,16,32], index: 1, kind: input, shape index: {}]   ;;  %s2594_s2 = inlined_call_operand.hbm [shape: f32[2,16,32], index: 2, kind: input, shape index: {}]   ;;  %s2595_s3 = inlined_call_operand.hbm [shape: bf16[32,32], index: 3, kind: input, shape index: {}]   ;;  %s2596_s4 = inlined_call_operand.hbm [shape: bf16[32,32], index: 4, kind: input, shape index: {}]   ;;  %s2597_s5 = inlined_call_operand.hbm [shape: bf16[32,32], index: 5, kind: input, shape index: {}]   ;;  %s2598_s6 = inlined_call_operand.hbm [shape: bf16[32,32], index: 6, kind: input, shape index: {}]   ;;  %s2599_s7 = inlined_call_operand.vmem [shape: f32[1,32], index: 7, kind: input, shape index: {}]   ;;  %s2600_s8 = inlined_call_operand.hbm [shape: f32[2,16,32], index: 8, kind: output, shape index: {}]  }
   0x1   :  { %2620 = sst [smem:[#allocation29_spill]] %s2593_s1 }
   0x2   :  { %2621 = sst [smem:[#allocation30_spill]] %s2594_s2 }
   0x3   :  { %2622 = sst [smem:[#allocation31_spill]] %s2595_s3 }
   0x4   :  { %2623 = sst [smem:[#allocation32_spill]] %s2596_s4 }
   0x5   :  { %2624 = sst [smem:[#allocation33_spill]] %s2597_s5 }
   0x6   :  { %2625 = sst [smem:[#allocation34_spill]] %s2598_s6 }
   0x7   :  { %2626 = sst [smem:[#allocation35_spill]] %s2599_s7 }
   0x8   :  { %2627 = sst [smem:[#allocation36_spill]] %s2600_s8 }
   0x9   :  { %13 = vsyncpa [#allocation5], 0 }
   0xa   :  { %15 = vsyncpa [#allocation5 + $0x1], 0 }
   0xb   :  { %16 = vsyncpa [#allocation8], 0 }
   0xc   :  { %18 = vsyncpa [#allocation8 + $0x1], 0 }
   0xd   :  { %19 = vsyncpa [#allocation11], 0 }
   0xe   :  { %20 = vsyncpa [#allocation14], 0 }
   0xf   :  { %21 = vsyncpa [#allocation6], 0 }
  0x10   :  { %23 = vsyncpa [#allocation6 + $0x1], 0  ;;  %s2154_s27 = smov 0   ;;  %s2156_s28 = smov 0  }
  0x11   :  { %s2158_s29 = smov 0   ;;  %s2160_s30 = smov 0  }
  0x12   :  { %s2162_s9 = smov 0   ;;  %s2164_s10 = smov 0  }
  0x13   :  { %s2166_s11 = smov 0   ;;  %s2168_s12 = smov 0  }
  0x14   :  { %s2170_s13 = smov 0   ;;  %s2172_s14 = smov 0  }
  0x15   :  { %s2174_s15 = smov 0  }
  0x16 LB: > { %2628 = sst [smem:[#allocation22_spill]] %s2049_s28  ;;  %s2210_s16 = sadd.s32 4294967295, %s2085_s15   ;;  %s2085_s15 = sphi %s2174_s15, %s29_s15   ;;  %s2081_s14 = sphi %s2172_s14, %s2684_s14   ;;  %s2077_s13 = sphi %s2170_s13, %s2683_s13   ;;  %s2073_s12 = sphi %s2168_s12, %s2682_s12   ;;  %s2069_s11 = sphi %s2166_s11, %s2681_s11   ;;  %s2065_s10 = sphi %s2164_s10, %s2680_s10   ;;  %s2061_s9 = sphi %s2162_s9, %s2679_s9   ;;  %s2057_s30 = sphi %s2160_s30, %s2678_s30   ;;  %s2053_s29 = sphi %s2158_s29, %s2677_s29   ;;  %s2049_s28 = sphi %s2156_s28, %s2676_s28   ;;  %s2045_s27 = sphi %s2154_s27, %s2673_s27  }
  0x17   : > { %2629 = sst [smem:[#allocation23_spill]] %s2069_s11  ;;  %p1401_p0 = scmp.ge.s32.totalorder %s2085_s15, 1 }
  0x18   : > { %2630 = sst [smem:[#allocation24_spill]] %s2073_s12  ;;  %p2608_p1 = scmp.eq.s32.totalorder %s2210_s16, 0 }
  0x19   : > { %p259_p2 = scmp.lt.s32.totalorder %s2085_s15, 5  ;;  %s2087_s18 = smov [#allocation10]  }
  0x1a   : > { %s271_s19 = sshll.u32 %s2087_s18, 4  ;;  %s2088_s21 = smov [#allocation13]   ;;  %s272_s19 = int_to_ptr.vmem [resolvable:$true] %s271_s19 }
  0x1b   : > { %p2215_p3 = pnand %p1401_p0, %p259_p2  ;;  %s297_s22 = sshll.u32 %s2088_s21, 4  ;;  %s298_s22 = int_to_ptr.vmem [resolvable:$true] %s297_s22 }
  0x1c   : > { %s1776_s23 = scalar_lea.vmem %s272_s19, 256  ;;  %p1784_p10 = scmp.lt.s32.totalorder %s272_s19, %s272_s19 }
  0x1d   : > { %s2631_s17 = scalar_select %p2215_p3, 1, 0 }
  0x1e   : > { %p1596_p4 = pneg %p2215_p3  ;;  %p1777_p7 = scmp.ne.s32.totalorder %s272_s19, %s1776_s23 }
  0x1f   : > { %2632 = sst [smem:[#allocation25_spill]] %s2631_s17  ;;  %p1785_p11 = scmp.lt.s32.totalorder %s1776_s23, %s1776_s23 }
  0x20   : > { %p2223_p5 = pnand %p1596_p4, %p2608_p1 }
  0x21   : > { %p1786_p12 = por %p1785_p11, %p1784_p10 }
  0x22   : > { %p1767_p6 = pneg %p2223_p5 }
  0x24   : > { %p1779_p8 = pnand %p1777_p7, %p1767_p6 }
  0x26   : > { %p1780_p9 = pneg %p1779_p8 }
  0x28   : > { %p1787_p13 = pnand %p1786_p12, %p1780_p9 }
  0x2a   : > { %1790 = shalt.err (!%p1787_p13)
}
  0x2b   : > { %s2602_s24 = smov 64   ;;  %s2604_s25 = smov 4  }
  0x2c   : > { %s2634_s3 = sld [smem:[#allocation31_spill]]  ;;  %s1802_s21 = scalar_lea.vmem %s298_s22, 256 }
  0x2d   : > { %p1803_p0 = scmp.ne.s32.totalorder %s298_s22, %s1802_s21  ;;  %p1810_p7 = scmp.lt.s32.totalorder %s298_s22, %s298_s22 }
  0x2e   : > { %p1811_p8 = scmp.lt.s32.totalorder %s1802_s21, %s1802_s21 }
  0x2f   : > { %p1805_p2 = pnand %p1803_p0, %p1767_p6 }
  0x30   : > { %p1812_p9 = por %p1811_p8, %p1810_p7 }
  0x31   : > { %p1806_p4 = pneg %p1805_p2 }
  0x32   : > { %1599 = dma.hbm_to_vmem [thread:$0]  (!%p2223_p5), %s2634_s3, 256, %s272_s19, [#allocation11], %s2602_s24, %s2602_s24, %s2604_s25  }
  0x33   : > { %p1813_p10 = pnand %p1812_p9, %p1806_p4 }
  0x35   : > { %1816 = shalt.err (!%p1813_p10)
}
  0x36   : > { %s2635_s5 = sld [smem:[#allocation33_spill]]  ;;  %p58_p11 = scmp.eq.s32.totalorder %s2085_s15, 0 }
  0x37   : > { %p83_p12 = scmp.ne.s32.totalorder %s2053_s29, %s2049_s28  ;;  %p89_p13 = scmp.ne.s32.totalorder %s2049_s28, %s2045_s27 }
  0x38   : > { %p2607_p0 = scmp.lt.s32.totalorder %s2085_s15, 4  ;;  %s347_s8 = sand.u32 1, %s2085_s15  }
  0x39   : > { %p85_p2 = por %p83_p12, %p58_p11  ;;  %p2262_p4 = por %p89_p13, %p2608_p1 }
  0x3a   : > { %s349_s26 = sand.u32 1, %s2053_s29   ;;  %s2606_s18 = sshll.u32 %s2081_s14, 8 }
  0x3b   : > { %s2636_s19 = scalar_select %p2262_p4, 1, 0 }
  0x3c   : > { %1605 = dma.hbm_to_vmem [thread:$0]  (!%p2223_p5), %s2635_s5, 256, %s298_s22, [#allocation14], %s2602_s24, %s2602_s24, %s2604_s25  }
  0x3d   : > { %2637 = sst [smem:[#allocation26_spill]] %s2636_s19  ;;  %s1410_s21 = sshll.u32 %s349_s26, 4 }
  0x3e   : > { %s2638_s1 = sld [smem:[#allocation29_spill]]  ;;  %p2275_p7 = pnand %p2607_p0, %p85_p2 }
  0x3f   : > { %s351_s24 = scalar_lea.vmem [#allocation7], %s1410_s21  ;;  %s2279_s5 = scalar_lea.sflag [#allocation8], %s347_s8 }
  0x40   : > { %s358_s25 = sshll.u32 %s351_s24, 4  ;;  %p2613_p8 = pneg %p2275_p7  ;;  %s359_s25 = int_to_ptr.vmem [resolvable:$true] %s358_s25 }
  0x41   : > { %s1830_s26 = scalar_lea.vmem %s359_s25, 256  ;;  %s2091_s3 = smov [#allocation7]  }
  0x42   : > { %p1831_p9 = scmp.ne.s32.totalorder %s359_s25, %s1830_s26  ;;  %s1835_s23 = sshll.u32 %s2091_s3, 4  ;;  %s1836_s23 = int_to_ptr.vmem [resolvable:$false] %s1835_s23 }
  0x43   : > { %p1838_p13 = scmp.lt.s32.totalorder %s359_s25, %s1836_s23 }
  0x44   : > { %s357_s22 = scalar_lea.hbm %s2638_s1, %s2606_s18  ;;  %p1833_p10 = pnand %p1831_p9, %p2613_p8 }
  0x45   : > { %s1837_s18 = scalar_lea.vmem %s1836_s23, 512 }
  0x46   : > { %p1834_p12 = pneg %p1833_p10  ;;  %p1839_p2 = scmp.lt.s32.totalorder %s1837_s18, %s1830_s26 }
  0x48   : > { %p1840_p0 = por %p1839_p2, %p1838_p13 }
  0x4a   : > { %p1841_p1 = pnand %p1840_p0, %p1834_p12 }
  0x4c   : > { %1844 = shalt.err (!%p1841_p1)
}
  0x4d   : > { %s2614_s24 = smov 128   ;;  %s2615_s8 = smov 8  }
  0x4e   : > { %1615 = dma.hbm_to_vmem [thread:$0]  (!%p2275_p7), %s357_s22, 256, %s359_s25, %s2279_s5, %s2614_s24, %s2614_s24, %s2615_s8  }
  0x4f   : > { %s2640_s1 = sshll.u32 %s2081_s14, 8  ;;  %s2641_s2 = sld [smem:[#allocation30_spill]] }
  0x50   : > { %s372_s18 = scalar_lea.vmem [#allocation9], %s1410_s21  ;;  %s2094_s12 = smov [#allocation12]  }
  0x51   : > { %s379_s26 = sshll.u32 %s372_s18, 4  ;;  %s284_s11 = sshll.u32 %s2094_s12, 4  ;;  %s2299_s26 = int_to_ptr.vmem [resolvable:$true] %s379_s26  ;;  %s285_s11 = int_to_ptr.vmem [resolvable:$true] %s284_s11 }
  0x52   : > { %s2095_s19 = smov [#allocation15]   ;;  %s1856_s17 = scalar_lea.vmem %s285_s11, 256 }
  0x53   : > { %s310_s28 = sshll.u32 %s2095_s19, 4  ;;  %p1857_p1 = scmp.ne.s32.totalorder %s285_s11, %s1856_s17  ;;  %s311_s28 = int_to_ptr.vmem [resolvable:$true] %s310_s28 }
  0x54   : > { %p1864_p10 = scmp.lt.s32.totalorder %s285_s11, %s285_s11  ;;  %p1865_p12 = scmp.lt.s32.totalorder %s1856_s17, %s1856_s17 }
  0x55   : > { %s2297_s23 = scalar_lea.hbm %s2641_s2, %s2640_s1  ;;  %p1859_p0 = pnand %p1857_p1, %p1767_p6 }
  0x56   : > { %p1866_p13 = por %p1865_p12, %p1864_p10 }
  0x57   : > { %p1860_p9 = pneg %p1859_p0 }
  0x59   : > { %p1867_p2 = pnand %p1866_p13, %p1860_p9 }
  0x5b   : > { %1870 = shalt.err (!%p1867_p2)
}
  0x5c   : > { %s2642_s1 = smov 4   ;;  %s2643_s7 = smov 64  }
  0x5d   : > { %s2644_s4 = sld [smem:[#allocation32_spill]]  ;;  %s1882_s19 = scalar_lea.vmem %s311_s28, 256 }
  0x5e   : > { %p1883_p8 = scmp.ne.s32.totalorder %s311_s28, %s1882_s19  ;;  %p1890_p10 = scmp.lt.s32.totalorder %s311_s28, %s311_s28 }
  0x5f   : > { %p1891_p9 = scmp.lt.s32.totalorder %s1882_s19, %s1882_s19 }
  0x60   : > { %p1885_p1 = pnand %p1883_p8, %p1767_p6 }
  0x61   : > { %p1892_p12 = por %p1891_p9, %p1890_p10 }
  0x62   : > { %p1886_p0 = pneg %p1885_p1 }
  0x63   : > { %1602 = dma.hbm_to_vmem [thread:$0]  (!%p2223_p5), %s2644_s4, 256, %s285_s11, [#allocation11], %s2643_s7, %s2643_s7, %s2642_s1  }
  0x64   : > { %p1893_p13 = pnand %p1892_p12, %p1886_p0 }
  0x66   : > { %1896 = shalt.err (!%p1893_p13)
}
  0x67   : > { %s2645_s6 = sld [smem:[#allocation34_spill]]  ;;  %s1400_s11 = sadd.s32 4294967294, %s2085_s15  }
  0x68   : > { %s38_s20 = sadd.s32 1, %s2077_s13  ;;  %s41_s22 = sadd.s32 1, %s2081_s14 }
  0x69   : > { %p39_p6 = scmp.ge.s32.totalorder %s38_s20, 2  ;;  %s50_s3 = sadd.s32 1, %s2065_s10 }
  0x6a   : > { %p57_p8 = scmp.ne.s32.totalorder %s2065_s10, %s2061_s9  ;;  %p63_p2 = scmp.ne.s32.totalorder %s2061_s9, %s2057_s30 }
  0x6b   : > { %s2686_s20 = smov (%p39_p6, %s38_s20), 0  ;;  %s2688_s22 = smov (!%p39_p6, %s41_s22), %s2081_s14 }
  0x6c   : > { %2646 = sst [smem:[#allocation27_spill]] %s2686_s20  ;;  %s46_s18 = ssub.s32 %s2077_s13, %s2686_s20 }
  0x6d   : > { %1608 = dma.hbm_to_vmem [thread:$0]  (!%p2223_p5), %s2645_s6, 256, %s311_s28, [#allocation14], %s2643_s7, %s2643_s7, %s2642_s1  }
  0x6e   : > { %p2338_p5 = por %p58_p11, %p57_p8  ;;  %p43_p1 = scmp.ge.s32.totalorder %s2688_s22, 2 }
  0x6f   : > { %p2648_p0 = scmp.eq.s32.totalorder %s2210_s16, 0  ;;  %s76_s7 = sadd.s32 1, %s2053_s29 }
  0x70   : > { %p246_p9 = scmp.eq.s32.totalorder %s2210_s16, 3  ;;  %s2690_s22 = smov (%p43_p1, %s2688_s22), 0 }
  0x71   : > { %p2347_p10 = por %p2648_p0, %p63_p2  ;;  %2650 = sst [smem:[#allocation28_spill]] %s2690_s22 }
  0x72   : > { %p2355_p12 = por %p246_p9, %p57_p8  ;;  %p252_p11 = scmp.eq.s32.totalorder %s1400_s11, 3 }
  0x73   : > { %s45_s25 = ssub.s32 %s2081_s14, %s2690_s22  ;;  %s327_s19 = sand.u32 1, %s2065_s10  }
  0x74   : > { %s2651_s12 = scalar_select %p2355_p12, 1, 0 }
  0x75   : > { %s47_s17 = sor.u32 %s46_s18, %s45_s25  ;;  %p74_p13 = scmp.eq.s32.totalorder %s45_s25, 0 }
  0x76   : > { %p48_p6 = scmp.eq.s32.totalorder %s47_s17, 0  ;;  %p2365_p0 = por %p252_p11, %p63_p2 }
  0x77   : > { %s2370_s24 = scalar_select %p74_p13, %s2053_s29, %s76_s7  }
  0x78   : > { %s2652_s21 = scalar_select %p2365_p0, 1, 0 }
  0x79   : > { %s2373_s8 = scalar_select %p48_p6, %s2065_s10, %s50_s3  }
  0x7a   : > { %s1407_s11 = sshll.u32 %s327_s19, 3  ;;  %s1408_s2 = sshll.u32 %s2081_s14, 1 }
  0x7b   : > { %s336_s4 = sadd.s32 %s2077_s13, %s1408_s2  ;;  %s331_s6 = scalar_lea.vmem [#allocation4], %s1407_s11 }
  0x7c   : > { %s340_s18 = sshll.u32 %s331_s6, 4  ;;  %s1409_s22 = sshll.u32 %s336_s4, 7  ;;  %s2379_s18 = int_to_ptr.vmem [resolvable:$true] %s340_s18 }
  0x7d   : > { %s2384_s20 = scalar_lea.hbm %s2592_s0, %s1409_s22  ;;  %p2653_p8 = scmp.lt.s32.totalorder %s2085_s15, 4 }
  0x7e   : > { %s1910_s7 = scalar_lea.vmem %s2299_s26, 256  ;;  %p2655_p9 = pneg %p2275_p7 }
  0x7f   : > { %p2390_p2 = pnand %p2653_p8, %p2338_p5  ;;  %p1911_p1 = scmp.ne.s32.totalorder %s2299_s26, %s1910_s7 }
  0x80   : > { %s2096_s2 = smov [#allocation9]  }
  0x81   : > { %p1913_p11 = pnand %p1911_p1, %p2655_p9  ;;  %s1915_s4 = sshll.u32 %s2096_s2, 4  ;;  %s1916_s4 = int_to_ptr.vmem [resolvable:$false] %s1915_s4 }
  0x82   : > { %s1917_s6 = scalar_lea.vmem %s1916_s4, 512  ;;  %p1918_p6 = scmp.lt.s32.totalorder %s2299_s26, %s1916_s4 }
  0x83   : > { %p1914_p13 = pneg %p1913_p11  ;;  %p1919_p0 = scmp.lt.s32.totalorder %s1917_s6, %s1910_s7 }
  0x85   : > { %p1920_p12 = por %p1919_p0, %p1918_p6 }
  0x87   : > { %p1921_p4 = pnand %p1920_p12, %p1914_p13 }
  0x89   : > { %1924 = shalt.err (!%p1921_p4)
}
  0x8a   : > { %s2656_s22 = smov 8   ;;  %s2657_s28 = smov 128  }
  0x8b   : > { %1618 = dma.hbm_to_vmem [thread:$0]  (!%p2275_p7), %s2297_s23, 256, %s2299_s26, %s2279_s5, %s2657_s28, %s2657_s28, %s2656_s22  }
  0x8c   : > { %s328_s11 = scalar_lea.sflag [#allocation5], %s327_s19  ;;  %p1927_p5 = pneg %p2390_p2 }
  0x8d   : > { %s1938_s25 = scalar_lea.vmem %s2379_s18, 128  ;;  %s2097_s27 = smov [#allocation4]  }
  0x8e   : > { %p1939_p4 = scmp.ne.s32.totalorder %s2379_s18, %s1938_s25  ;;  %s1943_s17 = sshll.u32 %s2097_s27, 4  ;;  %s1944_s17 = int_to_ptr.vmem [resolvable:$false] %s1943_s17 }
  0x8f   : > { %s1945_s7 = scalar_lea.vmem %s1944_s17, 256  ;;  %p1946_p8 = scmp.lt.s32.totalorder %s2379_s18, %s1944_s17 }
  0x90   : > { %p1941_p12 = pnand %p1939_p4, %p1927_p5  ;;  %p1947_p1 = scmp.lt.s32.totalorder %s1945_s7, %s1938_s25 }
  0x92   : > { %p1942_p0 = pneg %p1941_p12  ;;  %p1948_p9 = por %p1947_p1, %p1946_p8 }
  0x94   : > { %p1949_p11 = pnand %p1948_p9, %p1942_p0 }
  0x96   : > { %1952 = shalt.err (!%p1949_p11)
}
  0x97   : > { %1612 = dma.hbm_to_vmem [thread:$0]  (!%p2390_p2), %s2384_s20, 128, %s2379_s18, %s328_s11  }
  0x98   : > { %391 = sbr.rel (%p2215_p3) target bundleno = 1607 (0x647), region = 52  ;;  %s2422_s23 = sand.u32 (!%p2215_p3), 1, %s2061_s9  }
  0x99   : > { %s1417_s26 = sshll.u32 (!%p2215_p3), %s2422_s23, 3  ;;  %s394_s19 = scalar_lea.sflag (!%p2215_p3), [#allocation5], %s2422_s23 }
  0x9a   : > { %s2426_s2 = scalar_lea.vmem (!%p2215_p3), [#allocation4], %s1417_s26 }
  0x9d   : > { %2024 = dma.done.wait (%p2347_p10), %s394_s19, 128  }
  0x9e   : > { %2026 = vsyncadd (%p2347_p10), %s394_s19, 4294967168  ;;  %s2659_s20 = sld [smem:[#allocation22_spill]]  ;;  %s402_s3 = sand.u32 1, %s2210_s16  }
  0x9f   : > { %s2660_s18 = sld [smem:[#allocation26_spill]]  ;;  %s403_s22 = scalar_lea.sflag [#allocation8], %s402_s3 }
  0xa4   : > { %s404_s4 = sand.u32 1, %s2659_s20  }
  0xa5   : > { %s2434_s6 = sshll.u32 %s404_s4, 4  ;;  %p2661_p3 = scmp.ne.s32.totalorder %s2660_s18, 0 }
  0xa6   : > { %s406_s28 = scalar_lea.vmem [#allocation7], %s2434_s6 }
  0xa7   : > { %2028 = dma.done.wait (%p2661_p3), %s403_s22, 512  }
  0xa8   : > { %2030 = vsyncadd (%p2661_p3), %s403_s22, 4294966784  ;;  %s415_s11 = scalar_lea.vmem [#allocation9], %s2434_s6  ;;  %p2662_p7 = scmp.eq.s32.totalorder %s2210_s16, 0 }
  0xaa   : > { %2032 = dma.done.wait (%p2662_p7), [#allocation11], 512   ;;  %p2663_p10 = pmov %p2662_p7 }
  0xab   : > { %p2664_p2 = pmov %p2662_p7 }
  0xac   : > { %2034 = vsyncadd (%p2663_p10), [#allocation11], 4294966784 }
  0xad   : > { %2036 = dma.done.wait (%p2664_p2), [#allocation14], 512   ;;  %p2665_p13 = pmov %p2664_p2 }
  0xae   : > { %s2450_s1 = scalar_lea.vmem [#allocation16], %s1417_s26  ;;  %s2666_s25 = sld [smem:[#allocation23_spill]] }
  0xaf   : > { %2038 = vsyncadd (%p2665_p13), [#allocation14], 4294966784 }
  0xb4   : > { %p1425_p6 = scmp.ne.s32.totalorder %s2666_s25, 0 }
  0xb6   : > { %478 = sbr.rel (%p1425_p6) target bundleno = 397 (0x18d), region = 84 }
  0xbb   : > { %v1739_v0 = vld [vmem:[#allocation12 + $0x8] sm:$0xff]   ;;  %v2098_v1 = vmov 0.0   ;;  %v1740_v2 = vld [vmem:[#allocation13 + $0x8] sm:$0xff]   ;;  %v1741_v3 = vld [vmem:[#allocation12] sm:$0xff]   ;;  %vm2099_vm0 = vmmov 0   ;;  %vm501_vm1 = vcmask 261120  }
  0xbc   : > { %1492 = vmatprep.subr.bf16.mxu0 %v2098_v1  ;;  %1500 = vmatprep.subr.bf16.mxu1 %v2098_v1  ;;  %v1742_v4 = vld [vmem:[#allocation13] sm:$0xff]   ;;  %v480_v6 = vld [vmem:[%s406_s28 + $0x8] sm:$0xff]  ;;  %vm554_vm2 = vcmask 257024  }
  0xbd   : > { %1493 = vmatpush3.bf16.msra.mxu0 %v1739_v0  ;;  %1496 = vmatprep.mubr.msk.bf16.mxu0 %vm2099_vm0, %v2098_v1  ;;  %v479_v5 = vld [vmem:[%s406_s28] sm:$0xff]  ;;  %v483_v9 = vld [vmem:[%s415_s11 + $0x8] sm:$0xff] }
  0xbe   : > { %1501 = vmatpush3.bf16.msra.mxu1 %v1740_v2  ;;  %1494 = vmatprep.subr.bf16.mxu0 %v2098_v1  ;;  %v482_v7 = vld [vmem:[%s415_s11] sm:$0xff]  ;;  %v481_v8 = vpack.c.bf16 %v480_v6, %v479_v5 }
  0xbf   : > { %1502 = vmatprep.subr.bf16.mxu1 %v2098_v1  ;;  %1504 = vmatprep.mubr.msk.bf16.mxu1 %vm2099_vm0, %v2098_v1  ;;  %v484_v10 = vpack.c.bf16 %v483_v9, %v482_v7 }
  0xc1   : > { %1495 = vmatpush3.bf16.msra.mxu0 %v1741_v3 }
  0xc2   : > { %1503 = vmatpush3.bf16.msra.mxu1 %v1742_v4 }
  0xc4   : > { %1497 = vmatmul.mubr.msk.bf16.vlgmr.msra.gmra.mxu0 %vm501_vm1, %v481_v8 }
  0xc5   : > { %1505 = vmatmul.mubr.msk.bf16.vlgmr.msra.gmra.mxu1 %vm501_vm1, %v484_v10 }
 0x184   : > { %v539_v11 = vpop.f32.mrf.mxu0 }
 0x185   : > { %v1460_v12 = vpack.c.bf16 %v539_v11, %v539_v11  ;;  %v610_v13 = vpop.f32.mrf.mxu1 }
 0x186   : > { %v1462_v14 = vpack.c.bf16 %v610_v13, %v610_v13  ;;  %v1498_v15 = vpop.f32.mrf.mxu0 }
 0x187   : > { %555 = vst.msk [vmem:[#allocation2] sm:$0xf] %vm554_vm2, %v1460_v12  ;;  %v1506_v16 = vpop.f32.mrf.mxu1 }
 0x188   : > { %625 = vst.msk [vmem:[#allocation3] sm:$0xf] %vm554_vm2, %v1462_v14  ;;  %v542_v17 = vpop.f32.mrf.mxu0 }
 0x189   : > { %v1461_v18 = vpack.c.bf16 %v542_v17, %v542_v17  ;;  %v613_v19 = vpop.f32.mrf.mxu1 }
 0x18a   : > { %v1463_v20 = vpack.c.bf16 %v613_v19, %v613_v19  ;;  %v1499_v21 = vpop.f32.mrf.mxu0 }
 0x18b   : > { %556 = vst.msk [vmem:[#allocation2 + $0x4] sm:$0xf] %vm554_vm2, %v1461_v18  ;;  %v1507_v22 = vpop.f32.mrf.mxu1 }
 0x18c   : > { %626 = vst.msk [vmem:[#allocation3 + $0x4] sm:$0xf] %vm554_vm2, %v1463_v20 }
 0x18d PF: > { %v1743_v23 = vld [vmem:[#allocation10 + $0x8] sm:$0xff]   ;;  %v2100_v24 = vmov 0.0   ;;  %v1744_v25 = vld [vmem:[#allocation10] sm:$0xff]   ;;  %vm2101_vm3 = vmmov 0   ;;  %v627_v26 = vld [vmem:[%s2426_s2] sm:$0xff]  ;;  %vm699_vm4 = vcmask 64512  }
 0x18e   : > { %1508 = vmatprep.subr.bf16.mxu0 %v2100_v24  ;;  %1516 = vmatprep.subr.bf16.mxu1 %v2100_v24  ;;  %v628_v28 = vpack.c.bf16 %v627_v26, %v627_v26  ;;  %s2102_s16 = smov 120   ;;  %s2103_s27 = smov 112   ;;  %vm645_vm5 = vcmask 261120   ;;  %vm746_vm6 = vcmask 130048   ;;  %vm1147_vm7 = vcmask 195584  }
 0x18f   : > { %1509 = vmatpush3.bf16.msra.mxu0 %v1743_v23  ;;  %1512 = vmatprep.mubr.msk.bf16.mxu0 %vm2101_vm3, %v2100_v24  ;;  %s2104_s17 = smov 104   ;;  %s2105_s7 = smov 8  }
 0x190   : > { %1510 = vmatprep.subr.bf16.mxu0 %v2100_v24  ;;  %1518 = vmatprep.mubr.msk.bf16.mxu1 %vm2101_vm3, %v2100_v24  ;;  %s2106_s5 = smov 16   ;;  %s2107_s26 = smov 24  }
 0x191   : > { %s2667_s19 = sld [smem:[#allocation24_spill]]  ;;  %s1233_s28 = sshll.u32 %s2450_s1, 4  ;;  %s2530_s28 = int_to_ptr.vmem [resolvable:$true] %s1233_s28 }
 0x192   : > { %v1745_v27 = vld [vmem:[#allocation2] sm:$0xff]   ;;  %s2668_s2 = sld [smem:[#allocation23_spill]]  ;;  %p2671_p4 = scmp.ne.s32.totalorder %s2651_s12, 0 }
 0x193   : > { %811 = vrot.lane.b32.xlu0 %v1745_v27, %s2102_s16  ;;  %v704_v29 = vsel %vm699_vm4, %v1745_v27, 0  ;;  %919 = vrot.lane.b32.xlu1 %v1745_v27, %s2103_s27  ;;  %v1746_v49 = vld [vmem:[#allocation3] sm:$0xff]   ;;  %s2669_s6 = sld [smem:[#allocation35_spill]] }
 0x194   : > { %1511 = vmatpush3.bf16.msra.mxu0 %v1744_v25  ;;  %1517 = vmatpush3.bf16.xpose.msra.mxu1 %v704_v29 }
 0x195   : > { %1528 = vmatprep.subr.bf16.mxu1 %v2100_v24  ;;  %1522 = vmatprep.subr.bf16.mxu0 %v2100_v24 }
 0x197   : > { %1513 = vmatmul.mubr.msk.bf16.vlgmr.msra.gmra.mxu0 %vm645_vm5, %v628_v28  ;;  %s1454_s20 = sshll.u32 %s2667_s19, 1 }
 0x198   : > { %1524 = vmatprep.mubr.msk.bf16.mxu0 %vm2101_vm3, %v2100_v24  ;;  %1523 = vmatpush3.bf16.msra.mxu0 %v1746_v49  ;;  %s1229_s18 = sadd.s32 %s2668_s2, %s1454_s20 }
 0x199   : > { %1534 = vmatprep.subr.bf16.mxu0 %v2100_v24  ;;  %s1455_s22 = sshll.u32 %s1229_s18, 7 }
 0x205   : > { %v812_v30 = vpop.permute.xlu0 %811  ;;  %v920_v37 = vpop.permute.xlu1 %919 }
 0x206   : > { %v817_v34 = vsel %vm699_vm4, %v812_v30, 0  ;;  %v925_v38 = vsel %vm699_vm4, %v920_v37, 0 }
 0x257   : > { %v683_v31 = vpop.f32.mrf.mxu0 }
 0x258   : > { %v689_v32 = vpack.c.bf16 %v683_v31, %v683_v31 }
 0x259   : > { %v1514_v33 = vpop.f32.mrf.mxu0 }
 0x25a   : > { %917 = vrot.lane.b32.xlu1 %v689_v32, %s2103_s27  ;;  %809 = vrot.lane.b32.xlu0 %v689_v32, %s2102_s16 }
 0x25b   : > { %1519 = vmatmul.mubr.msk.bf16.vlgmr.msra.gmra.mxu1 %vm699_vm4, %v689_v32  ;;  %v686_v35 = vpop.f32.mrf.mxu0 }
 0x25c   : > { %1529 = vmatpush3.bf16.xpose.msra.mxu1 %v817_v34  ;;  %1530 = vmatprep.mubr.msk.bf16.mxu1 %vm2101_vm3, %v2100_v24  ;;  %v1747_v35 = vld [vmem:[#allocation15 + $0x8] sm:$0xff]  }
 0x25d   : > { %v1515_v36 = vpop.f32.mrf.mxu0  ;;  %1540 = vmatprep.subr.bf16.mxu1 %v2100_v24 }
 0x25e   : > { %1025 = vrot.lane.b32.xlu1 %v689_v32, %s2104_s17  ;;  %1027 = vrot.lane.b32.xlu0 %v1745_v27, %s2104_s17 }
 0x2cc   : > { %v810_v39 = vpop.permute.xlu0 %809  ;;  %v918_v42 = vpop.permute.xlu1 %917 }
 0x2cd   : > { %1531 = vmatmul.mubr.msk.bf16.vlgmr.msra.gmra.mxu1 %vm699_vm4, %v810_v39  ;;  %v1748_v39 = vld [vmem:[#allocation15] sm:$0xff]  }
 0x2ce   : > { %1541 = vmatpush3.bf16.xpose.msra.mxu1 %v925_v38  ;;  %1542 = vmatprep.mubr.msk.bf16.mxu1 %vm2101_vm3, %v2100_v24 }
 0x2cf   : > { %1552 = vmatprep.subr.bf16.mxu1 %v2100_v24 }
 0x2d0   : > { %v1028_v40 = vpop.permute.xlu0 %1027  ;;  %v1026_v43 = vpop.permute.xlu1 %1025 }
 0x2d1   : > { %v1033_v41 = vsel %vm699_vm4, %v1028_v40, 0 }
 0x2d5   : > { %1543 = vmatmul.mubr.msk.bf16.vlgmr.msra.gmra.mxu1 %vm699_vm4, %v918_v42 }
 0x2d6   : > { %1553 = vmatpush3.bf16.xpose.msra.mxu1 %v1033_v41  ;;  %1554 = vmatprep.mubr.msk.bf16.mxu1 %vm2101_vm3, %v2100_v24 }
 0x2d7   : > { %1564 = vmatprep.subr.bf16.mxu1 %v2100_v24 }
 0x2dd   : > { %1555 = vmatmul.mubr.msk.bf16.vlgmr.msra.gmra.mxu1 %vm699_vm4, %v1026_v43 }
 0x2de   : > { %1568 = vmatprep.mubr.msk.bf16.mxu1 %vm2101_vm3, %v2100_v24  ;;  %1565 = vmatpush3.bf16.msra.mxu1 %v1747_v35 }
 0x2df   : > { %1566 = vmatprep.subr.bf16.mxu1 %v2100_v24 }
 0x2e2   : > { %1567 = vmatpush3.bf16.msra.mxu1 %v1748_v39 }
 0x31b   : > { %v740_v44 = vpop.f32.mrf.mxu1 }
 0x31c   : > { %v747_v45 = vsel %vm746_vm6, %v740_v44, -inf }
 0x31d   : > { %748 = vmax.xlane.f32.xlu0 %v747_v45  ;;  %v1520_v46 = vpop.f32.mrf.mxu1 }
 0x31f   : > { %v743_v47 = vpop.f32.mrf.mxu1 }
 0x321   : > { %v1521_v48 = vpop.f32.mrf.mxu1 }
 0x38d   : > { %v853_v50 = vpop.f32.mrf.mxu1 }
 0x38e   : > { %v859_v51 = vsel %vm746_vm6, %v853_v50, -inf }
 0x38f   : > { %860 = vmax.xlane.f32.xlu1 %v859_v51  ;;  %v1532_v52 = vpop.f32.mrf.mxu1 }
 0x391   : > { %v856_v53 = vpop.f32.mrf.mxu1 }
 0x393   : > { %v1533_v54 = vpop.f32.mrf.mxu1 }
 0x395   : > { %v961_v55 = vpop.f32.mrf.mxu1 }
 0x396   : > { %v967_v56 = vsel %vm746_vm6, %v961_v55, -inf }
 0x397   : > { %968 = vmax.xlane.f32.xlu0 %v967_v56  ;;  %v1544_v57 = vpop.f32.mrf.mxu1 }
 0x399   : > { %v964_v58 = vpop.f32.mrf.mxu1 }
 0x39b   : > { %v1545_v59 = vpop.f32.mrf.mxu1 }
 0x39d   : > { %v1069_v60 = vpop.f32.mrf.mxu1 }
 0x39e   : > { %v1075_v61 = vsel %vm746_vm6, %v1069_v60, -inf }
 0x39f   : > { %1076 = vmax.xlane.f32.xlu0 %v1075_v61  ;;  %v1556_v62 = vpop.f32.mrf.mxu1 }
 0x3a0   : > { %869 = vrot.lane.b32.xlu1 %v1746_v49, %s2102_s16  ;;  %s2670_s16 = sld [smem:[#allocation36_spill]] }
 0x3a1   : > { %v1072_v63 = vpop.f32.mrf.mxu1 }
 0x3a3   : > { %v1557_v0 = vpop.f32.mrf.mxu1 }
 0x3a4   : > { %1085 = vrot.lane.b32.xlu1 %v1746_v49, %s2104_s17  ;;  %s1218_s17 = scalar_lea.sflag [#allocation6], %s2422_s23 }
 0x3a6   : > { %v749_v1 = vpop.xlane.xlu0 %748 }
 0x3a7   : > { %v750_v2 = vsub.f32 %v740_v44, %v749_v1  ;;  %v1449_v1 = vld [vmem:[%s2669_s6] ss:$0 sm:$0xff] }
 0x3a9   : > { %v751_v3 = vmul.f32 1.442695, %v750_v2 }
 0x3ab   : > { %1749 = vpow2.f32 %v751_v3 }
 0x3b5   : > { %977 = vrot.lane.b32.xlu0 %v1746_v49, %s2103_s27  ;;  %s2528_s27 = scalar_lea.hbm %s2670_s16, %s1455_s22 }
 0x3b8   : > { %v1750_v4 = vpop.eup %1749 }
 0x3b9   : > { %v756_v5 = vpack.c.bf16 %v1750_v4, %v1750_v4  ;;  %v753_v20 = vsel %vm746_vm6, %v1750_v4, 0.0 }
 0x3bb   : > { %1525 = vmatmul.mubr.msk.bf16.vlgmr.msra.gmra.mxu0 %vm746_vm6, %v756_v5 }
 0x3bc   : > { %1536 = vmatprep.mubr.msk.bf16.mxu0 %vm2101_vm3, %v2100_v24 }
 0x418   : > { %v861_v6 = vpop.xlane.xlu1 %860 }
 0x419   : > { %v862_v7 = vsub.f32 %v853_v50, %v861_v6 }
 0x41b   : > { %v863_v8 = vmul.f32 1.442695, %v862_v7 }
 0x41c   : > { %v870_v9 = vpop.permute.xlu1 %869 }
 0x41d   : > { %1751 = vpow2.f32 %v863_v8  ;;  %1535 = vmatpush3.bf16.msra.mxu0 %v870_v9 }
 0x41e   : > { %1546 = vmatprep.subr.bf16.mxu0 %v2100_v24 }
 0x420   : > { %v969_v10 = vpop.xlane.xlu0 %968  ;;  %v1086_v22 = vpop.permute.xlu1 %1085 }
 0x421   : > { %v970_v11 = vsub.f32 %v961_v55, %v969_v10 }
 0x423   : > { %v971_v12 = vmul.f32 1.442695, %v970_v11 }
 0x425   : > { %1753 = vpow2.f32 %v971_v12 }
 0x428   : > { %v1077_v13 = vpop.xlane.xlu0 %1076 }
 0x429   : > { %v1078_v14 = vsub.f32 %v1069_v60, %v1077_v13 }
 0x42a   : > { %v1752_v15 = vpop.eup %1751 }
 0x42b   : > { %v1079_v16 = vmul.f32 1.442695, %v1078_v14  ;;  %v865_v17 = vsel %vm746_vm6, %v1752_v15, 0.0  ;;  %v868_v18 = vpack.c.bf16 %v1752_v15, %v1752_v15 }
 0x42c   : > { %866 = vadd.xlane.f32.xlu1 %v865_v17  ;;  %v978_v19 = vpop.permute.xlu0 %977 }
 0x42d   : > { %1755 = vpow2.f32 %v1079_v16  ;;  %1537 = vmatmul.mubr.msk.bf16.vlgmr.msra.gmra.mxu0 %vm746_vm6, %v868_v18 }
 0x42e   : > { %1547 = vmatpush3.bf16.msra.mxu0 %v978_v19  ;;  %1548 = vmatprep.mubr.msk.bf16.mxu0 %vm2101_vm3, %v2100_v24 }
 0x42f   : > { %1558 = vmatprep.subr.bf16.mxu0 %v2100_v24 }
 0x430   : > { %754 = vadd.xlane.f32.xlu1 %v753_v20 }
 0x432   : > { %v1754_v21 = vpop.eup %1753 }
 0x433   : > { %v973_v23 = vsel %vm746_vm6, %v1754_v21, 0.0  ;;  %v976_v25 = vpack.c.bf16 %v1754_v21, %v1754_v21 }
 0x434   : > { %974 = vadd.xlane.f32.xlu0 %v973_v23 }
 0x435   : > { %1549 = vmatmul.mubr.msk.bf16.vlgmr.msra.gmra.mxu0 %vm746_vm6, %v976_v25 }
 0x436   : > { %1559 = vmatpush3.bf16.msra.mxu0 %v1086_v22  ;;  %1560 = vmatprep.mubr.msk.bf16.mxu0 %vm2101_vm3, %v2100_v24 }
 0x43a   : > { %v1756_v26 = vpop.eup %1755 }
 0x43b   : > { %v1081_v27 = vsel %vm746_vm6, %v1756_v26, 0.0  ;;  %v1084_v28 = vpack.c.bf16 %v1756_v26, %v1756_v26 }
 0x43c   : > { %1082 = vadd.xlane.f32.xlu0 %v1081_v27 }
 0x43d   : > { %1561 = vmatmul.mubr.msk.bf16.vlgmr.msra.gmra.mxu0 %vm746_vm6, %v1084_v28 }
 0x47b   : > { %v800_v29 = vpop.f32.mrf.mxu0 }
 0x47d   : > { %v1526_v30 = vpop.f32.mrf.mxu0 }
 0x47f   : > { %v803_v31 = vpop.f32.mrf.mxu0 }
 0x481   : > { %v1527_v32 = vpop.f32.mrf.mxu0 }
 0x4b5   : > { %v867_v33 = vpop.xlane.xlu1 %866 }
 0x4b6   : > { %1757 = vrcp.f32 %v867_v33 }
 0x4b9   : > { %v755_v55 = vpop.xlane.xlu1 %754 }
 0x4bd   : > { %v975_v34 = vpop.xlane.xlu0 %974 }
 0x4be   : > { %1759 = vrcp.f32 %v975_v34 }
 0x4c3   : > { %v1758_v36 = vpop.eup %1757 }
 0x4c5   : > { %v1083_v37 = vpop.xlane.xlu0 %1082 }
 0x4c6   : > { %1761 = vrcp.f32 %v1083_v37 }
 0x4c7   : > { %1763 = vrcp.f32 %v755_v55 }
 0x4cb   : > { %v1760_v44 = vpop.eup %1759 }
 0x4d3   : > { %v1762_v50 = vpop.eup %1761 }
 0x4d4   : > { %v1764_v56 = vpop.eup %1763 }
 0x4d5   : > { %v807_v59 = vmul.f32 %v1764_v56, %v800_v29 }
 0x4ed   : > { %v909_v38 = vpop.f32.mrf.mxu0 }
 0x4ee   : > { %v916_v40 = vmul.f32 %v1758_v36, %v909_v38 }
 0x4ef   : > { %v1538_v41 = vpop.f32.mrf.mxu0 }
 0x4f0   : > { %1134 = vrot.lane.b32.xlu0 %v916_v40, %s2105_s7  ;;  %s1953_s7 = scalar_lea.vmem %s2530_s28, 128 }
 0x4f1   : > { %v912_v42 = vpop.f32.mrf.mxu0  ;;  %p1954_p5 = scmp.ne.s32.totalorder %s2530_s28, %s1953_s7 }
 0x4f3   : > { %v1539_v43 = vpop.f32.mrf.mxu0  ;;  %p1955_p12 = pnand %p1954_p5, %p2671_p4 }
 0x4f5   : > { %v1017_v45 = vpop.f32.mrf.mxu0  ;;  %p1956_p0 = pneg %p1955_p12 }
 0x4f6   : > { %v1024_v46 = vmul.f32 %v1760_v44, %v1017_v45 }
 0x4f7   : > { %v1550_v47 = vpop.f32.mrf.mxu0 }
 0x4f8   : > { %1138 = vrot.lane.b32.xlu1 %v1024_v46, %s2106_s5  ;;  %s2108_s5 = smov [#allocation16]  }
 0x4f9   : > { %v1020_v48 = vpop.f32.mrf.mxu0 }
 0x4fb   : > { %v1551_v49 = vpop.f32.mrf.mxu0 }
 0x4fd   : > { %v1125_v51 = vpop.f32.mrf.mxu0 }
 0x4fe   : > { %v1132_v52 = vmul.f32 %v1762_v50, %v1125_v51 }
 0x4ff   : > { %v1562_v53 = vpop.f32.mrf.mxu0 }
 0x500   : > { %1142 = vrot.lane.b32.xlu1 %v1132_v52, %s2107_s26  ;;  %s1957_s26 = sshll.u32 %s2108_s5, 4  ;;  %s1958_s26 = int_to_ptr.vmem [resolvable:$false] %s1957_s26 }
 0x501   : > { %v1128_v24 = vpop.f32.mrf.mxu0  ;;  %s1959_s19 = scalar_lea.vmem %s1958_s26, 256  ;;  %p1960_p8 = scmp.lt.s32.totalorder %s2530_s28, %s1958_s26 }
 0x502   : > { %p1961_p1 = scmp.lt.s32.totalorder %s1959_s19, %s1953_s7 }
 0x503   : > { %v1563_v54 = vpop.f32.mrf.mxu0 }
 0x504   : > { %p1962_p9 = por %p1961_p1, %p1960_p8 }
 0x506   : > { %p1963_p11 = pnand %p1962_p9, %p1956_p0 }
 0x562   : > { %v1135_v57 = vpop.permute.xlu0 %1134 }
 0x563   : > { %v1145_v60 = vsel %vm699_vm4, %v807_v59, %v1135_v57 }
 0x56a   : > { %v1139_v58 = vpop.permute.xlu1 %1138 }
 0x56b   : > { %v1146_v61 = vsel %vm746_vm6, %v1145_v60, %v1139_v58 }
 0x572   : > { %v1143_v62 = vpop.permute.xlu1 %1142 }
 0x573   : > { %v1148_v63 = vsel %vm1147_vm7, %v1146_v61, %v1143_v62 }
 0x574   : > { %v1149_v0 = vpack.c.bf16 %v1148_v63, %v1148_v63 }
 0x576   : > { %1569 = vmatmul.mubr.msk.bf16.vlgmr.msra.gmra.mxu1 %vm645_vm5, %v1149_v0 }
 0x636   : > { %v1210_v2 = vpop.f32.mrf.mxu1 }
 0x637   : > { %v1211_v3 = vadd.f32 %v1449_v1, %v1210_v2 }
 0x638   : > { %v1570_v4 = vpop.f32.mrf.mxu1 }
 0x639   : > { %1216 = vst.msk [vmem:[%s2450_s1] sm:$0xff] %vm645_vm5, %v1211_v3 }
 0x63a   : > { %v1213_v5 = vpop.f32.mrf.mxu1 }
 0x63b   : > { %1966 = shalt.err (!%p1963_p11)
}
 0x63c   : > { %s1967_s1 = scalar_lea.hbm %s2528_s27, 128  ;;  %s1971_s20 = scalar_lea.hbm %s2670_s16, 512 }
 0x63d   : > { %p1968_p3 = scmp.ne.s32.totalorder %s2528_s27, %s1967_s1  ;;  %p1972_p2 = scmp.lt.s32.totalorder %s2528_s27, %s2670_s16 }
 0x63e   : > { %p1973_p13 = scmp.lt.s32.totalorder %s1971_s20, %s1967_s1 }
 0x63f   : > { %p1969_p7 = pnand %p1968_p3, %p2671_p4 }
 0x640   : > { %p1974_p6 = por %p1973_p13, %p1972_p2 }
 0x641   : > { %p1970_p10 = pneg %p1969_p7 }
 0x643   : > { %p1975_p5 = pnand %p1974_p6, %p1970_p10 }
 0x645   : > { %1978 = shalt.err (!%p1975_p5)
}
 0x646   : > { %1594 = dma.vmem_to_hbm [thread:$0]  (%p2671_p4), %s2530_s28, 128, %s2528_s27, %s1218_s17   ;;  %v1571_v6 = vpop.f32.mrf.mxu1 }
 0x647 PF: > { %p1632_p12 = scmp.ge.s32.totalorder %s2085_s15, 2  ;;  %s1245_s4 = sand.u32 1, %s2057_s30  }
 0x648   : > { %p2672_p0 = scmp.ne.s32.totalorder %s2652_s21, 0  ;;  %s1246_s6 = scalar_lea.sflag [#allocation6], %s1245_s4 }
 0x64a   : > { %p1620_p8 = pnand %p1632_p12, %p2672_p0 }
 0x64c   : > { %p1621_p1 = pneg %p1620_p8 }
 0x64e   : > { %2040 = dma.done.wait (%p1621_p1), %s1246_s6, 128  }
 0x64f   : > { %2042 = vsyncadd (%p1621_p1), %s1246_s6, 4294967168  ;;  %s29_s15 = sadd.s32 1, %s2085_s15   ;;  %s2673_s27 = sld [smem:[#allocation22_spill]] }
 0x650   : > { %p26_p9 = scmp.ge.s32.totalorder %s29_s15, 6   ;;  %s2674_s22 = sld [smem:[#allocation27_spill]] }
 0x651   : > { %s2675_s25 = sld [smem:[#allocation28_spill]]  ;;  %s2676_s28 = smov %s2053_s29 }
 0x652   : > { %s2677_s29 = smov %s2370_s24  ;;  %s2678_s30 = smov %s2061_s9 }
 0x653   : > { %s2679_s9 = smov %s2065_s10  ;;  %s2680_s10 = smov %s2373_s8 }
 0x654   : > { %s2681_s11 = smov %s2077_s13  ;;  %s2682_s12 = smov %s2081_s14 }
 0x655   :  { %28 = sbr.rel (!%p26_p9) target bundleno = 22 (0x16), region = 141 }
 0x656   : > { %s2683_s13 = smov %s2674_s22 }
 0x657   : > { %s2684_s14 = smov %s2675_s25 }
 0x65a   :  { %1251 = vsyncpa [#allocation5], 1 }
 0x65b   :  { %1253 = vsyncpa [#allocation5 + $0x1], 1 }
 0x65c   :  { %1254 = vsyncpa [#allocation8], 1 }
 0x65d   :  { %1256 = vsyncpa [#allocation8 + $0x1], 1 }
 0x65e   :  { %1257 = vsyncpa [#allocation11], 1 }
 0x65f   :  { %1258 = vsyncpa [#allocation14], 1 }
 0x660   :  { %1259 = vsyncpa [#allocation6], 1 }
 0x661   :  { %1261 = vsyncpa [#allocation6 + $0x1], 1 }

</bundles_post_ra>
